<compile_context>
chip_gen: v5e
topology: v5e:2x2
jax: 0.10.0
libtpu: 0.0.40
codegen_flags: <defaults>
</compile_context>

<pallas_src>
import jax
import jax.numpy as jnp
from jax import lax
from jax.experimental import pallas as pl
from jax.experimental.pallas import tpu as pltpu

EPS = 1e-5          # torch BatchNorm1d default eps
SLOPE = 0.01        # torch LeakyReLU default negative_slope
LANES = 128

# Layer dims: encoder 57->32->16->8->6, expander 6->16->32 (latent_dim=6, expanded_dim=32)
LAYER_DIMS = [(57, 32), (32, 16), (16, 8), (8, 6), (6, 16), (16, 32)]


def _round_up(n, m):
    return (n + m - 1) // m * m


# Static row offsets of each layer's block inside the single packed parameter
# buffer.  Block layout: [fan_in rows of W | 1 row gamma | 1 row beta], padded
# to an 8-row (sublane) boundary; all rows lane-padded to 128.
_LAYER_OFFSETS = []
_off = 0
for _fi, _fo in LAYER_DIMS:
    _LAYER_OFFSETS.append(_off)
    _off += _round_up(_fi + 2, 8)
PACKED_ROWS = _off  # = 176


def simple_dense_kernel(x_ref, p_ref, out_ref):
    h = x_ref[...]                       # (batch, 57) f32
    inv_n = 1.0 / x_ref.shape[0]         # static batch size
    n_layers = len(LAYER_DIMS)

    for idx, (fan_in, fan_out) in enumerate(LAYER_DIMS):
        off = _LAYER_OFFSETS[idx]
        w = p_ref[off:off + fan_in, :fan_out]                        # (fi, fo)
        gamma = p_ref[off + fan_in:off + fan_in + 1, :fan_out]       # (1, fo)
        beta = p_ref[off + fan_in + 1:off + fan_in + 2, :fan_out]    # (1, fo)

        # Linear (bias-free: absorbed by train-mode BN). bf16 operands, f32 acc.
        h = jnp.dot(h.astype(jnp.bfloat16), w.astype(jnp.bfloat16),
                    preferred_element_type=jnp.float32)

        # Fused training-mode BatchNorm1d: one pass for sum / sum-of-squares,
        # then a single scale/shift.  rsqrt rides the otherwise-idle EUP slot.
        s1 = jnp.sum(h, axis=0, keepdims=True)
        s2 = jnp.sum(h * h, axis=0, keepdims=True)
        mean = s1 * inv_n
        var = s2 * inv_n - mean * mean
        scale = gamma * lax.rsqrt(var + EPS)
        shift = beta - mean * scale
        h = h * scale + shift

        # LeakyReLU on every layer except the final expander BN output.
        if idx < n_layers - 1:
            h = jnp.where(h >= 0.0, h, SLOPE * h)

    out_ref[...] = h


def init_params(key):
    """Deterministic, PyTorch-like initialization (uniform +/- 1/sqrt(fan_in))."""
    params = []
    for fan_in, fan_out in LAYER_DIMS:
        key, kw, kb, kg, kbeta = jax.random.split(key, 5)
        bound = 1.0 / (fan_in ** 0.5)
        w = jax.random.uniform(kw, (fan_in, fan_out), jnp.float32, -bound, bound)
        b = jax.random.uniform(kb, (1, fan_out), jnp.float32, -bound, bound)
        gamma = 1.0 + 0.1 * jax.random.normal(kg, (1, fan_out), jnp.float32)
        beta = 0.1 * jax.random.normal(kbeta, (1, fan_out), jnp.float32)
        params.append((w, b, gamma, beta))
    return params


def pack_params(params):
    """Pack (W, gamma, beta) of all layers into one [PACKED_ROWS, 128] buffer.

    The Linear bias `b` is intentionally dropped: with training-mode BatchNorm
    right after every Linear, the bias cancels exactly in the BN centering.
    """
    blocks = []
    for (w, b, gamma, beta), (fi, fo) in zip(params, LAYER_DIMS):
        blk = jnp.zeros((_round_up(fi + 2, 8), LANES), jnp.float32)
        blk = blk.at[:fi, :fo].set(w)
        blk = blk.at[fi, :fo].set(gamma.reshape(-1))
        blk = blk.at[fi + 1, :fo].set(beta.reshape(-1))
        blocks.append(blk)
    return jnp.concatenate(blocks, axis=0)


def simple_dense_forward(x, packed_params):
    batch = x.shape[0]
    out_dim = LAYER_DIMS[-1][1]

    flops = 2 * batch * sum(fi * fo for fi, fo in LAYER_DIMS)
    transcendentals = sum(fo for _, fo in LAYER_DIMS)      # one rsqrt per BN feature
    bytes_accessed = 4 * (x.size + packed_params.size + batch * out_dim)

    return pl.pallas_call(
        simple_dense_kernel,
        out_shape=jax.ShapeDtypeStruct((batch, out_dim), jnp.float32),
        in_specs=[pl.BlockSpec(memory_space=pltpu.MemorySpace.VMEM),
                  pl.BlockSpec(memory_space=pltpu.MemorySpace.VMEM)],
        out_specs=pl.BlockSpec(memory_space=pltpu.MemorySpace.VMEM),
        cost_estimate=pl.CostEstimate(flops=flops,
                                      transcendentals=transcendentals,
                                      bytes_accessed=bytes_accessed),
    )(x, packed_params)


def reference_forward(x, params):
    """Pure-JAX reference: full f32, WITH Linear biases, two-pass BN stats."""
    h = x
    for idx, (w, b, gamma, beta) in enumerate(params):
        h = h @ w + b
        mean = jnp.mean(h, axis=0, keepdims=True)
        var = jnp.mean((h - mean) ** 2, axis=0, keepdims=True)
        h = (h - mean) * lax.rsqrt(var + EPS) * gamma + beta
        if idx < len(params) - 1:
            h = jnp.where(h >= 0, h, SLOPE * h)
    return h


if __name__ == "__main__":
    key = jax.random.PRNGKey(0)
    key_x, key_p = jax.random.split(key)

    batch = 8
    x = jax.random.normal(key_x, (batch, 57), jnp.float32)
    params = init_params(key_p)
    packed = pack_params(params)

    z = simple_dense_forward(x, packed)
    jax.block_until_ready(z)
    assert z.shape == (batch, 32), z.shape

    # Validate bias-drop + fused BN + bf16 matmul against the f32/biased reference
    # (BN renormalizes every layer, so bf16 operand error stays ~1e-2 absolute).
    ref = reference_forward(x, params)
    assert jnp.allclose(z, ref, atol=1e-1, rtol=1e-1), float(jnp.max(jnp.abs(z - ref)))

    print("KERNEL_OK")
</pallas_src>

<mosaic_0001>
module attributes {stable_mosaic.version = 11 : i64} {
  func.func @simple_dense_kernel(%arg0: memref<8x57xf32, #tpu.memory_space<vmem>>, %arg1: memref<176x128xf32, #tpu.memory_space<vmem>>, %arg2: memref<8x32xf32, #tpu.memory_space<vmem>>) attributes {dimension_semantics = [], scalar_prefetch = 0 : i64, scratch_operands = 0 : i64, tpu.core_type = #tpu.core_type<tc>} {
    %c0 = arith.constant 0 : index
    %c0_0 = arith.constant 0 : index
    %0 = vector.load %arg0[%c0, %c0_0] : memref<8x57xf32, #tpu.memory_space<vmem>>, vector<8x57xf32>
    %c0_1 = arith.constant 0 : index
    %c0_2 = arith.constant 0 : index
    %1 = vector.load %arg1[%c0_1, %c0_2] : memref<176x128xf32, #tpu.memory_space<vmem>>, vector<57x32xf32>
    %c57 = arith.constant 57 : index
    %c0_3 = arith.constant 0 : index
    %2 = vector.load %arg1[%c57, %c0_3] : memref<176x128xf32, #tpu.memory_space<vmem>>, vector<1x32xf32>
    %c58 = arith.constant 58 : index
    %c0_4 = arith.constant 0 : index
    %3 = vector.load %arg1[%c58, %c0_4] : memref<176x128xf32, #tpu.memory_space<vmem>>, vector<1x32xf32>
    %4 = arith.truncf %0 : vector<8x57xf32> to vector<8x57xbf16>
    %5 = arith.truncf %1 : vector<57x32xf32> to vector<57x32xbf16>
    %cst = arith.constant dense<0.000000e+00> : vector<8x32xf32>
    %6 = tpu.matmul %4, %5, %cst {dimension_numbers = #tpu.dot_dimension_numbers<[1], [0], [0], [1], [0, 0, 1, 1], [], []>} : vector<8x57xbf16>, vector<57x32xbf16>, vector<8x32xf32> -> vector<8x32xf32>
    %cst_5 = arith.constant dense<0.000000e+00> : vector<32xf32>
    %7 = vector.multi_reduction <add>, %6, %cst_5 [0] : vector<8x32xf32> to vector<32xf32>
    %8 = vector.shape_cast %7 : vector<32xf32> to vector<1x32xf32>
    %9 = arith.mulf %6, %6 : vector<8x32xf32>
    %cst_6 = arith.constant dense<0.000000e+00> : vector<32xf32>
    %10 = vector.multi_reduction <add>, %9, %cst_6 [0] : vector<8x32xf32> to vector<32xf32>
    %11 = vector.shape_cast %10 : vector<32xf32> to vector<1x32xf32>
    %cst_7 = arith.constant 1.250000e-01 : f32
    %12 = vector.broadcast %cst_7 : f32 to vector<1x32xf32>
    %13 = arith.mulf %8, %12 : vector<1x32xf32>
    %cst_8 = arith.constant 1.250000e-01 : f32
    %14 = vector.broadcast %cst_8 : f32 to vector<1x32xf32>
    %15 = arith.mulf %11, %14 : vector<1x32xf32>
    %16 = arith.mulf %13, %13 : vector<1x32xf32>
    %17 = arith.subf %15, %16 : vector<1x32xf32>
    %cst_9 = arith.constant 9.99999974E-6 : f32
    %18 = vector.broadcast %cst_9 : f32 to vector<1x32xf32>
    %19 = arith.addf %17, %18 : vector<1x32xf32>
    %20 = math.rsqrt %19 : vector<1x32xf32>
    %21 = arith.mulf %2, %20 : vector<1x32xf32>
    %22 = arith.mulf %13, %21 : vector<1x32xf32>
    %23 = arith.subf %3, %22 : vector<1x32xf32>
    %24 = vector.broadcast %21 : vector<1x32xf32> to vector<8x32xf32>
    %25 = arith.mulf %6, %24 : vector<8x32xf32>
    %26 = vector.broadcast %23 : vector<1x32xf32> to vector<8x32xf32>
    %27 = arith.addf %25, %26 : vector<8x32xf32>
    %cst_10 = arith.constant 0.000000e+00 : f32
    %28 = vector.broadcast %cst_10 : f32 to vector<8x32xf32>
    %29 = arith.cmpf oge, %27, %28 : vector<8x32xf32>
    %cst_11 = arith.constant 0.00999999977 : f32
    %30 = vector.broadcast %cst_11 : f32 to vector<8x32xf32>
    %31 = arith.mulf %30, %27 : vector<8x32xf32>
    %32 = arith.select %29, %27, %31 : vector<8x32xi1>, vector<8x32xf32>
    %c64 = arith.constant 64 : index
    %c0_12 = arith.constant 0 : index
    %33 = vector.load %arg1[%c64, %c0_12] : memref<176x128xf32, #tpu.memory_space<vmem>>, vector<32x16xf32>
    %c96 = arith.constant 96 : index
    %c0_13 = arith.constant 0 : index
    %34 = vector.load %arg1[%c96, %c0_13] : memref<176x128xf32, #tpu.memory_space<vmem>>, vector<1x16xf32>
    %c97 = arith.constant 97 : index
    %c0_14 = arith.constant 0 : index
    %35 = vector.load %arg1[%c97, %c0_14] : memref<176x128xf32, #tpu.memory_space<vmem>>, vector<1x16xf32>
    %36 = arith.truncf %32 : vector<8x32xf32> to vector<8x32xbf16>
    %37 = arith.truncf %33 : vector<32x16xf32> to vector<32x16xbf16>
    %cst_15 = arith.constant dense<0.000000e+00> : vector<8x16xf32>
    %38 = tpu.matmul %36, %37, %cst_15 {dimension_numbers = #tpu.dot_dimension_numbers<[1], [0], [0], [1], [0, 0, 1, 1], [], []>} : vector<8x32xbf16>, vector<32x16xbf16>, vector<8x16xf32> -> vector<8x16xf32>
    %cst_16 = arith.constant dense<0.000000e+00> : vector<16xf32>
    %39 = vector.multi_reduction <add>, %38, %cst_16 [0] : vector<8x16xf32> to vector<16xf32>
    %40 = vector.shape_cast %39 : vector<16xf32> to vector<1x16xf32>
    %41 = arith.mulf %38, %38 : vector<8x16xf32>
    %cst_17 = arith.constant dense<0.000000e+00> : vector<16xf32>
    %42 = vector.multi_reduction <add>, %41, %cst_17 [0] : vector<8x16xf32> to vector<16xf32>
    %43 = vector.shape_cast %42 : vector<16xf32> to vector<1x16xf32>
    %cst_18 = arith.constant 1.250000e-01 : f32
    %44 = vector.broadcast %cst_18 : f32 to vector<1x16xf32>
    %45 = arith.mulf %40, %44 : vector<1x16xf32>
    %cst_19 = arith.constant 1.250000e-01 : f32
    %46 = vector.broadcast %cst_19 : f32 to vector<1x16xf32>
    %47 = arith.mulf %43, %46 : vector<1x16xf32>
    %48 = arith.mulf %45, %45 : vector<1x16xf32>
    %49 = arith.subf %47, %48 : vector<1x16xf32>
    %cst_20 = arith.constant 9.99999974E-6 : f32
    %50 = vector.broadcast %cst_20 : f32 to vector<1x16xf32>
    %51 = arith.addf %49, %50 : vector<1x16xf32>
    %52 = math.rsqrt %51 : vector<1x16xf32>
    %53 = arith.mulf %34, %52 : vector<1x16xf32>
    %54 = arith.mulf %45, %53 : vector<1x16xf32>
    %55 = arith.subf %35, %54 : vector<1x16xf32>
    %56 = vector.broadcast %53 : vector<1x16xf32> to vector<8x16xf32>
    %57 = arith.mulf %38, %56 : vector<8x16xf32>
    %58 = vector.broadcast %55 : vector<1x16xf32> to vector<8x16xf32>
    %59 = arith.addf %57, %58 : vector<8x16xf32>
    %cst_21 = arith.constant 0.000000e+00 : f32
    %60 = vector.broadcast %cst_21 : f32 to vector<8x16xf32>
    %61 = arith.cmpf oge, %59, %60 : vector<8x16xf32>
    %cst_22 = arith.constant 0.00999999977 : f32
    %62 = vector.broadcast %cst_22 : f32 to vector<8x16xf32>
    %63 = arith.mulf %62, %59 : vector<8x16xf32>
    %64 = arith.select %61, %59, %63 : vector<8x16xi1>, vector<8x16xf32>
    %c104 = arith.constant 104 : index
    %c0_23 = arith.constant 0 : index
    %65 = vector.load %arg1[%c104, %c0_23] : memref<176x128xf32, #tpu.memory_space<vmem>>, vector<16x8xf32>
    %c120 = arith.constant 120 : index
    %c0_24 = arith.constant 0 : index
    %66 = vector.load %arg1[%c120, %c0_24] : memref<176x128xf32, #tpu.memory_space<vmem>>, vector<1x8xf32>
    %c121 = arith.constant 121 : index
    %c0_25 = arith.constant 0 : index
    %67 = vector.load %arg1[%c121, %c0_25] : memref<176x128xf32, #tpu.memory_space<vmem>>, vector<1x8xf32>
    %68 = arith.truncf %64 : vector<8x16xf32> to vector<8x16xbf16>
    %69 = arith.truncf %65 : vector<16x8xf32> to vector<16x8xbf16>
    %cst_26 = arith.constant dense<0.000000e+00> : vector<8x8xf32>
    %70 = tpu.matmul %68, %69, %cst_26 {dimension_numbers = #tpu.dot_dimension_numbers<[1], [0], [0], [1], [0, 0, 1, 1], [], []>} : vector<8x16xbf16>, vector<16x8xbf16>, vector<8x8xf32> -> vector<8x8xf32>
    %cst_27 = arith.constant dense<0.000000e+00> : vector<8xf32>
    %71 = vector.multi_reduction <add>, %70, %cst_27 [0] : vector<8x8xf32> to vector<8xf32>
    %72 = vector.shape_cast %71 : vector<8xf32> to vector<1x8xf32>
    %73 = arith.mulf %70, %70 : vector<8x8xf32>
    %cst_28 = arith.constant dense<0.000000e+00> : vector<8xf32>
    %74 = vector.multi_reduction <add>, %73, %cst_28 [0] : vector<8x8xf32> to vector<8xf32>
    %75 = vector.shape_cast %74 : vector<8xf32> to vector<1x8xf32>
    %cst_29 = arith.constant 1.250000e-01 : f32
    %76 = vector.broadcast %cst_29 : f32 to vector<1x8xf32>
    %77 = arith.mulf %72, %76 : vector<1x8xf32>
    %cst_30 = arith.constant 1.250000e-01 : f32
    %78 = vector.broadcast %cst_30 : f32 to vector<1x8xf32>
    %79 = arith.mulf %75, %78 : vector<1x8xf32>
    %80 = arith.mulf %77, %77 : vector<1x8xf32>
    %81 = arith.subf %79, %80 : vector<1x8xf32>
    %cst_31 = arith.constant 9.99999974E-6 : f32
    %82 = vector.broadcast %cst_31 : f32 to vector<1x8xf32>
    %83 = arith.addf %81, %82 : vector<1x8xf32>
    %84 = math.rsqrt %83 : vector<1x8xf32>
    %85 = arith.mulf %66, %84 : vector<1x8xf32>
    %86 = arith.mulf %77, %85 : vector<1x8xf32>
    %87 = arith.subf %67, %86 : vector<1x8xf32>
    %88 = vector.broadcast %85 : vector<1x8xf32> to vector<8x8xf32>
    %89 = arith.mulf %70, %88 : vector<8x8xf32>
    %90 = vector.broadcast %87 : vector<1x8xf32> to vector<8x8xf32>
    %91 = arith.addf %89, %90 : vector<8x8xf32>
    %cst_32 = arith.constant 0.000000e+00 : f32
    %92 = vector.broadcast %cst_32 : f32 to vector<8x8xf32>
    %93 = arith.cmpf oge, %91, %92 : vector<8x8xf32>
    %cst_33 = arith.constant 0.00999999977 : f32
    %94 = vector.broadcast %cst_33 : f32 to vector<8x8xf32>
    %95 = arith.mulf %94, %91 : vector<8x8xf32>
    %96 = arith.select %93, %91, %95 : vector<8x8xi1>, vector<8x8xf32>
    %c128 = arith.constant 128 : index
    %c0_34 = arith.constant 0 : index
    %97 = vector.load %arg1[%c128, %c0_34] : memref<176x128xf32, #tpu.memory_space<vmem>>, vector<8x6xf32>
    %c136 = arith.constant 136 : index
    %c0_35 = arith.constant 0 : index
    %98 = vector.load %arg1[%c136, %c0_35] : memref<176x128xf32, #tpu.memory_space<vmem>>, vector<1x6xf32>
    %c137 = arith.constant 137 : index
    %c0_36 = arith.constant 0 : index
    %99 = vector.load %arg1[%c137, %c0_36] : memref<176x128xf32, #tpu.memory_space<vmem>>, vector<1x6xf32>
    %100 = arith.truncf %96 : vector<8x8xf32> to vector<8x8xbf16>
    %101 = arith.truncf %97 : vector<8x6xf32> to vector<8x6xbf16>
    %cst_37 = arith.constant dense<0.000000e+00> : vector<8x6xf32>
    %102 = tpu.matmul %100, %101, %cst_37 {dimension_numbers = #tpu.dot_dimension_numbers<[1], [0], [0], [1], [0, 0, 1, 1], [], []>} : vector<8x8xbf16>, vector<8x6xbf16>, vector<8x6xf32> -> vector<8x6xf32>
    %cst_38 = arith.constant dense<0.000000e+00> : vector<6xf32>
    %103 = vector.multi_reduction <add>, %102, %cst_38 [0] : vector<8x6xf32> to vector<6xf32>
    %104 = vector.shape_cast %103 : vector<6xf32> to vector<1x6xf32>
    %105 = arith.mulf %102, %102 : vector<8x6xf32>
    %cst_39 = arith.constant dense<0.000000e+00> : vector<6xf32>
    %106 = vector.multi_reduction <add>, %105, %cst_39 [0] : vector<8x6xf32> to vector<6xf32>
    %107 = vector.shape_cast %106 : vector<6xf32> to vector<1x6xf32>
    %cst_40 = arith.constant 1.250000e-01 : f32
    %108 = vector.broadcast %cst_40 : f32 to vector<1x6xf32>
    %109 = arith.mulf %104, %108 : vector<1x6xf32>
    %cst_41 = arith.constant 1.250000e-01 : f32
    %110 = vector.broadcast %cst_41 : f32 to vector<1x6xf32>
    %111 = arith.mulf %107, %110 : vector<1x6xf32>
    %112 = arith.mulf %109, %109 : vector<1x6xf32>
    %113 = arith.subf %111, %112 : vector<1x6xf32>
    %cst_42 = arith.constant 9.99999974E-6 : f32
    %114 = vector.broadcast %cst_42 : f32 to vector<1x6xf32>
    %115 = arith.addf %113, %114 : vector<1x6xf32>
    %116 = math.rsqrt %115 : vector<1x6xf32>
    %117 = arith.mulf %98, %116 : vector<1x6xf32>
    %118 = arith.mulf %109, %117 : vector<1x6xf32>
    %119 = arith.subf %99, %118 : vector<1x6xf32>
    %120 = vector.broadcast %117 : vector<1x6xf32> to vector<8x6xf32>
    %121 = arith.mulf %102, %120 : vector<8x6xf32>
    %122 = vector.broadcast %119 : vector<1x6xf32> to vector<8x6xf32>
    %123 = arith.addf %121, %122 : vector<8x6xf32>
    %cst_43 = arith.constant 0.000000e+00 : f32
    %124 = vector.broadcast %cst_43 : f32 to vector<8x6xf32>
    %125 = arith.cmpf oge, %123, %124 : vector<8x6xf32>
    %cst_44 = arith.constant 0.00999999977 : f32
    %126 = vector.broadcast %cst_44 : f32 to vector<8x6xf32>
    %127 = arith.mulf %126, %123 : vector<8x6xf32>
    %128 = arith.select %125, %123, %127 : vector<8x6xi1>, vector<8x6xf32>
    %c144 = arith.constant 144 : index
    %c0_45 = arith.constant 0 : index
    %129 = vector.load %arg1[%c144, %c0_45] : memref<176x128xf32, #tpu.memory_space<vmem>>, vector<6x16xf32>
    %c150 = arith.constant 150 : index
    %c0_46 = arith.constant 0 : index
    %130 = vector.load %arg1[%c150, %c0_46] : memref<176x128xf32, #tpu.memory_space<vmem>>, vector<1x16xf32>
    %c151 = arith.constant 151 : index
    %c0_47 = arith.constant 0 : index
    %131 = vector.load %arg1[%c151, %c0_47] : memref<176x128xf32, #tpu.memory_space<vmem>>, vector<1x16xf32>
    %132 = arith.truncf %128 : vector<8x6xf32> to vector<8x6xbf16>
    %133 = arith.truncf %129 : vector<6x16xf32> to vector<6x16xbf16>
    %cst_48 = arith.constant dense<0.000000e+00> : vector<8x16xf32>
    %134 = tpu.matmul %132, %133, %cst_48 {dimension_numbers = #tpu.dot_dimension_numbers<[1], [0], [0], [1], [0, 0, 1, 1], [], []>} : vector<8x6xbf16>, vector<6x16xbf16>, vector<8x16xf32> -> vector<8x16xf32>
    %cst_49 = arith.constant dense<0.000000e+00> : vector<16xf32>
    %135 = vector.multi_reduction <add>, %134, %cst_49 [0] : vector<8x16xf32> to vector<16xf32>
    %136 = vector.shape_cast %135 : vector<16xf32> to vector<1x16xf32>
    %137 = arith.mulf %134, %134 : vector<8x16xf32>
    %cst_50 = arith.constant dense<0.000000e+00> : vector<16xf32>
    %138 = vector.multi_reduction <add>, %137, %cst_50 [0] : vector<8x16xf32> to vector<16xf32>
    %139 = vector.shape_cast %138 : vector<16xf32> to vector<1x16xf32>
    %cst_51 = arith.constant 1.250000e-01 : f32
    %140 = vector.broadcast %cst_51 : f32 to vector<1x16xf32>
    %141 = arith.mulf %136, %140 : vector<1x16xf32>
    %cst_52 = arith.constant 1.250000e-01 : f32
    %142 = vector.broadcast %cst_52 : f32 to vector<1x16xf32>
    %143 = arith.mulf %139, %142 : vector<1x16xf32>
    %144 = arith.mulf %141, %141 : vector<1x16xf32>
    %145 = arith.subf %143, %144 : vector<1x16xf32>
    %cst_53 = arith.constant 9.99999974E-6 : f32
    %146 = vector.broadcast %cst_53 : f32 to vector<1x16xf32>
    %147 = arith.addf %145, %146 : vector<1x16xf32>
    %148 = math.rsqrt %147 : vector<1x16xf32>
    %149 = arith.mulf %130, %148 : vector<1x16xf32>
    %150 = arith.mulf %141, %149 : vector<1x16xf32>
    %151 = arith.subf %131, %150 : vector<1x16xf32>
    %152 = vector.broadcast %149 : vector<1x16xf32> to vector<8x16xf32>
    %153 = arith.mulf %134, %152 : vector<8x16xf32>
    %154 = vector.broadcast %151 : vector<1x16xf32> to vector<8x16xf32>
    %155 = arith.addf %153, %154 : vector<8x16xf32>
    %cst_54 = arith.constant 0.000000e+00 : f32
    %156 = vector.broadcast %cst_54 : f32 to vector<8x16xf32>
    %157 = arith.cmpf oge, %155, %156 : vector<8x16xf32>
    %cst_55 = arith.constant 0.00999999977 : f32
    %158 = vector.broadcast %cst_55 : f32 to vector<8x16xf32>
    %159 = arith.mulf %158, %155 : vector<8x16xf32>
    %160 = arith.select %157, %155, %159 : vector<8x16xi1>, vector<8x16xf32>
    %c152 = arith.constant 152 : index
    %c0_56 = arith.constant 0 : index
    %161 = vector.load %arg1[%c152, %c0_56] : memref<176x128xf32, #tpu.memory_space<vmem>>, vector<16x32xf32>
    %c168 = arith.constant 168 : index
    %c0_57 = arith.constant 0 : index
    %162 = vector.load %arg1[%c168, %c0_57] : memref<176x128xf32, #tpu.memory_space<vmem>>, vector<1x32xf32>
    %c169 = arith.constant 169 : index
    %c0_58 = arith.constant 0 : index
    %163 = vector.load %arg1[%c169, %c0_58] : memref<176x128xf32, #tpu.memory_space<vmem>>, vector<1x32xf32>
    %164 = arith.truncf %160 : vector<8x16xf32> to vector<8x16xbf16>
    %165 = arith.truncf %161 : vector<16x32xf32> to vector<16x32xbf16>
    %cst_59 = arith.constant dense<0.000000e+00> : vector<8x32xf32>
    %166 = tpu.matmul %164, %165, %cst_59 {dimension_numbers = #tpu.dot_dimension_numbers<[1], [0], [0], [1], [0, 0, 1, 1], [], []>} : vector<8x16xbf16>, vector<16x32xbf16>, vector<8x32xf32> -> vector<8x32xf32>
    %cst_60 = arith.constant dense<0.000000e+00> : vector<32xf32>
    %167 = vector.multi_reduction <add>, %166, %cst_60 [0] : vector<8x32xf32> to vector<32xf32>
    %168 = vector.shape_cast %167 : vector<32xf32> to vector<1x32xf32>
    %169 = arith.mulf %166, %166 : vector<8x32xf32>
    %cst_61 = arith.constant dense<0.000000e+00> : vector<32xf32>
    %170 = vector.multi_reduction <add>, %169, %cst_61 [0] : vector<8x32xf32> to vector<32xf32>
    %171 = vector.shape_cast %170 : vector<32xf32> to vector<1x32xf32>
    %cst_62 = arith.constant 1.250000e-01 : f32
    %172 = vector.broadcast %cst_62 : f32 to vector<1x32xf32>
    %173 = arith.mulf %168, %172 : vector<1x32xf32>
    %cst_63 = arith.constant 1.250000e-01 : f32
    %174 = vector.broadcast %cst_63 : f32 to vector<1x32xf32>
    %175 = arith.mulf %171, %174 : vector<1x32xf32>
    %176 = arith.mulf %173, %173 : vector<1x32xf32>
    %177 = arith.subf %175, %176 : vector<1x32xf32>
    %cst_64 = arith.constant 9.99999974E-6 : f32
    %178 = vector.broadcast %cst_64 : f32 to vector<1x32xf32>
    %179 = arith.addf %177, %178 : vector<1x32xf32>
    %180 = math.rsqrt %179 : vector<1x32xf32>
    %181 = arith.mulf %162, %180 : vector<1x32xf32>
    %182 = arith.mulf %173, %181 : vector<1x32xf32>
    %183 = arith.subf %163, %182 : vector<1x32xf32>
    %184 = vector.broadcast %181 : vector<1x32xf32> to vector<8x32xf32>
    %185 = arith.mulf %166, %184 : vector<8x32xf32>
    %186 = vector.broadcast %183 : vector<1x32xf32> to vector<8x32xf32>
    %187 = arith.addf %185, %186 : vector<8x32xf32>
    %c0_65 = arith.constant 0 : index
    %c0_66 = arith.constant 0 : index
    %188 = vector.load %arg2[%c0_65, %c0_66] : memref<8x32xf32, #tpu.memory_space<vmem>>, vector<8x32xf32>
    tpu.vector_store %arg2[%c0_65, %c0_66], %187 {strides = array<i32>} : memref<8x32xf32, #tpu.memory_space<vmem>>, vector<8x32xf32>,
    return
  }
}

</mosaic_0001>

<bundles_post_ra>
// kernel: tpu_custom_call.1
= control target key start
LH: loop header
LB: loop body
LE: loop exit
PB: predicated region body
PF: predicated region fallthrough
CT: control target
= control target key end

     0   :  { %7 = vsyncpa [#allocation3], 0  ;;  %s613_s0 = inlined_call_operand.hbm [shape: f32[8,57], index: 0, kind: input, shape index: {}]   ;;  %s614_s1 = inlined_call_operand.hbm [shape: f32[176,128], index: 1, kind: input, shape index: {}]   ;;  %s615_s2 = inlined_call_operand.hbm [shape: f32[8,32], index: 2, kind: output, shape index: {}]  }
   0x1   :  { %8 = vsyncpa [#allocation6], 0 }
   0x2   :  { %9 = vsyncpa [#allocation4], 0  ;;  %s15_s11 = sshll.u32 %s613_s0, 4  ;;  %s563_s12 = smov [#allocation2]   ;;  %s16_s11 = int_to_ptr.hbm [resolvable:$true] %s15_s11 }
   0x3   :  { %s17_s13 = sshll.u32 %s563_s12, 4  ;;  %s25_s16 = sshll.u32 %s614_s1, 4  ;;  %s18_s13 = int_to_ptr.vmem [resolvable:$true] %s17_s13  ;;  %s26_s16 = int_to_ptr.hbm [resolvable:$true] %s25_s16 }
   0x4   :  { %20 = dma.hbm_to_vmem [thread:$0]  %s16_s11, 128, %s18_s13, [#allocation3]  }
   0x5   :  { %s564_s17 = smov [#allocation5]   ;;  %s565_s19 = smov 128  }
   0x6   :  { %s27_s18 = sshll.u32 %s564_s17, 4  ;;  %s566_s20 = smov 8   ;;  %s28_s18 = int_to_ptr.vmem [resolvable:$true] %s27_s18 }
   0x7   :  { %33 = dma.hbm_to_vmem [thread:$0]  %s26_s16, 2816, %s28_s18, [#allocation6], %s565_s19, %s565_s19, %s566_s20  }
   0x8   :  { %557 = dma.done.wait [#allocation3], 128  }
   0x9   :  { %558 = vsyncadd [#allocation3], 4294967168 }
   0xa   :  { %559 = dma.done.wait [#allocation6], 2816  }
   0xb   :  { %560 = vsyncadd [#allocation6], 4294964480  ;;  %vm63_vm0 = vcmask 1043456   ;;  %vm64_vm1 = vcmask 1044480   ;;  %v567_v0 = vmov 65535   ;;  %v50_v2 = vld [vmem:[#allocation5 + $0x30] sm:$0xff] }
   0xc   :  { %v65_v1 = vsel %vm63_vm0, 4294967295, %v567_v0  ;;  %v51_v3 = vld [vmem:[#allocation5 + $0x38] sm:$0x1]  ;;  %v48_v6 = vld [vmem:[#allocation5 + $0x20] sm:$0xff]  ;;  %v49_v7 = vld [vmem:[#allocation5 + $0x28] sm:$0xff]  ;;  %vm59_vm2 = vcmask 465920  }
   0xd   :  { %v66_v4 = vsel %vm64_vm1, %v65_v1, 0  ;;  %v58_v5 = vpack.c.bf16 %v51_v3, %v50_v2  ;;  %v57_v9 = vpack.c.bf16 %v49_v7, %v48_v6  ;;  %v46_v10 = vld [vmem:[#allocation5 + $0x10] sm:$0xff]  ;;  %v47_v11 = vld [vmem:[#allocation5 + $0x18] sm:$0xff]  ;;  %v44_v13 = vld [vmem:[#allocation5] sm:$0xff]  ;;  %vm83_vm3 = vcmask 261120   ;;  %s568_s0 = smov [#allocation7]  }
   0xe   :  { %v56_v12 = vpack.c.bf16 %v47_v11, %v46_v10  ;;  %v45_v14 = vld [vmem:[#allocation5 + $0x8] sm:$0xff]  ;;  %v43_v16 = vld [vmem:[#allocation2] sm:$0xff]  ;;  %v126_v34 = vld [vmem:[#allocation5 + $0x50] sm:$0xff]  ;;  %vm149_vm8 = vcmask 130048   ;;  %vm212_vm13 = vcmask 64512   ;;  %s448_s1 = sshll.u32 %s568_s0, 4  ;;  %s449_s1 = int_to_ptr.vmem [resolvable:$true] %s448_s1 }
   0xf   :  { %v68_v8 = vand.u32 %v66_v4, %v58_v5  ;;  %v55_v15 = vpack.c.bf16 %v45_v14, %v44_v13  ;;  %v54_v17 = vpack.c.bf16 %v43_v16, %v43_v16  ;;  %v127_v35 = vld [vmem:[#allocation5 + $0x58] sm:$0xff]  ;;  %v124_v41 = vld [vmem:[#allocation5 + $0x40] sm:$0xff]  ;;  %v125_v42 = vld [vmem:[#allocation5 + $0x48] sm:$0xff]  ;;  %s450_s23 = sshll.u32 %s615_s2, 4  ;;  %s451_s23 = int_to_ptr.hbm [resolvable:$true] %s450_s23 }
  0x10   :  { %v132_v38 = vpack.c.bf16 %v127_v35, %v126_v34  ;;  %v131_v43 = vpack.c.bf16 %v125_v42, %v124_v41  ;;  %v52_v51 = vld [vmem:[#allocation5 + $0x39] sm:$0x1]  ;;  %v53_v55 = vld [vmem:[#allocation5 + $0x3a] sm:$0x1]  ;;  %v129_v35 = vld [vmem:[#allocation5 + $0x61] sm:$0x1] }
  0x11   :  { %74 = vmatpush.bf16.msra.mxu0 %v68_v8 }
  0x12   :  { %142 = vmatpush.bf16.msra.mxu1 %v132_v38 }
  0x15   :  { %75 = vmatpush.bf16.msra.mxu0 %v57_v9 }
  0x16   :  { %143 = vmatpush.bf16.msra.mxu1 %v131_v43 }
  0x19   :  { %76 = vmatpush.bf16.msra.mxu0 %v56_v12 }
  0x1d   :  { %77 = vmatpush.bf16.msra.mxu0 %v55_v15 }
  0x20   :  { %461 = vmatmul.msk.bf16.vlgmr.msra.gmra.mxu0 %vm59_vm2, %v54_v17  ;;  %vm277_vm2 = vcmask 48128  }
  0x9d   :  { %v79_v18 = vpop.f32.mrf.mxu0 }
  0x9e   :  { %v84_v19 = vsel %vm83_vm3, %v79_v18, 0.0  ;;  %v91_v20 = vmul.f32 %v79_v18, %v79_v18 }
  0x9f   :  { %v85_v21 = vrot.slane %v84_v19, 4 }
  0xa0   :  { %v92_v22 = vsel %vm83_vm3, %v91_v20, 0.0 }
  0xa1   :  { %v86_v23 = vadd.f32 %v85_v21, %v84_v19  ;;  %v93_v24 = vrot.slane %v92_v22, 4  ;;  %v190_v21 = vld [vmem:[#allocation5 + $0x68] sm:$0xff] }
  0xa3   :  { %v87_v25 = vrot.slane %v86_v23, 2  ;;  %v94_v26 = vadd.f32 %v93_v24, %v92_v22  ;;  %v191_v22 = vld [vmem:[#allocation5 + $0x70] sm:$0xff] }
  0xa5   :  { %v88_v27 = vadd.f32 %v87_v25, %v86_v23  ;;  %v95_v28 = vrot.slane %v94_v26, 2  ;;  %v81_v29 = vpop.f32.mrf.mxu0  ;;  %v195_v23 = vpack.c.bf16 %v191_v22, %v190_v21 }
  0xa7   :  { %v89_v30 = vrot.slane %v88_v27, 1  ;;  %v96_v31 = vadd.f32 %v95_v28, %v94_v26  ;;  %206 = vmatpush.bf16.msra.mxu2 %v195_v23 }
  0xa9   :  { %v90_v32 = vadd.f32 %v89_v30, %v88_v27  ;;  %v97_v33 = vrot.slane %v96_v31, 1 }
  0xab   :  { %v98_v36 = vadd.f32 %v97_v33, %v96_v31  ;;  %v99_v37 = vmul.f32 0.125, %v90_v32  ;;  %v128_v31 = vld [vmem:[#allocation5 + $0x60] sm:$0x1] }
  0xad   :  { %v100_v39 = vmul.f32 0.125, %v98_v36  ;;  %v101_v40 = vmul.f32 %v99_v37, %v99_v37 }
  0xaf   :  { %v102_v44 = vsub.f32 %v100_v39, %v101_v40 }
  0xb1   :  { %v103_v45 = vadd.f32 1e-05, %v102_v44 }
  0xb3   :  { %473 = vrsqrt.f32 %v103_v45  ;;  %vm110_vm5 = vweird.f32 %v103_v45 }
  0xb9   :  { %v474_v46 = vpop.eup %473 }
  0xba   :  { %v105_v47 = vmul.f32 %v474_v46, %v103_v45  ;;  %vm111_vm4 = vweird.f32 %v474_v46  ;;  %v253_v45 = vld [vmem:[#allocation5 + $0x80] sm:$0xff] }
  0xbb   :  { %vm112_vm6 = vmor %vm110_vm5, %vm111_vm4  ;;  %vm326_vm4 = vcmask 1042432  }
  0xbc   :  { %v106_v48 = vmul.f32 %v474_v46, %v105_v47 }
  0xbe   :  { %v107_v49 = vmul.f32 0.5, %v106_v48 }
  0xc0   :  { %v108_v50 = vsub.f32 1.5, %v107_v49 }
  0xc2   :  { %v109_v52 = vmul.f32 %v474_v46, %v108_v50 }
  0xc4   :  { %v113_v53 = vsel %vm112_vm6, %v474_v46, %v109_v52  ;;  %v257_v46 = vpack.c.bf16 %v253_v45, %v253_v45  ;;  %v318_v45 = vld [vmem:[#allocation5 + $0x90] sm:$0x3f] }
  0xc5   :  { %v114_v54 = vmul.f32 %v113_v53, %v52_v51 }
  0xc6   :  { %v262_v47 = vsel %vm63_vm0, %v257_v46, 0  ;;  %v322_v46 = vpack.c.bf16 %v318_v45, %v318_v45 }
  0xc7   :  { %v115_v56 = vmul.f32 %v114_v54, %v99_v37  ;;  %v117_v57 = vperm.slane %v114_v54, 0  ;;  %271 = vmatpush.bf16.msra.mxu3 %v262_v47 }
  0xc9   :  { %v116_v58 = vsub.f32 %v53_v55, %v115_v56  ;;  %v118_v59 = vmul.f32 %v117_v57, %v79_v18 }
  0xcb   :  { %v119_v60 = vperm.slane %v116_v58, 0 }
  0xcd   :  { %v120_v61 = vadd.f32 %v119_v60, %v118_v59 }
  0xcf   :  { %vm121_vm7 = vcmp.ge.f32.partialorder %v120_v61, 0.0  ;;  %v122_v62 = vmul.f32 0.01, %v120_v61 }
  0xd1   :  { %v123_v63 = vsel %vm121_vm7, %v120_v61, %v122_v62 }
  0xd2   :  { %v130_v0 = vpack.c.bf16 %v123_v63, %v123_v63 }
  0xd4   :  { %462 = vmatmul.msk.bf16.vlgmr.msra.gmra.mxu1 %vm83_vm3, %v130_v0 }
 0x151   :  { %v145_v1 = vpop.f32.mrf.mxu1 }
 0x152   :  { %v150_v2 = vsel %vm149_vm8, %v145_v1, 0.0  ;;  %v157_v3 = vmul.f32 %v145_v1, %v145_v1 }
 0x153   :  { %v151_v4 = vrot.slane %v150_v2, 4 }
 0x154   :  { %v158_v5 = vsel %vm149_vm8, %v157_v3, 0.0 }
 0x155   :  { %v152_v6 = vadd.f32 %v151_v4, %v150_v2  ;;  %v159_v7 = vrot.slane %v158_v5, 4 }
 0x157   :  { %v153_v8 = vrot.slane %v152_v6, 2  ;;  %v160_v9 = vadd.f32 %v159_v7, %v158_v5 }
 0x159   :  { %v154_v10 = vadd.f32 %v153_v8, %v152_v6  ;;  %v161_v11 = vrot.slane %v160_v9, 2  ;;  %v147_v12 = vpop.f32.mrf.mxu1 }
 0x15b   :  { %v155_v13 = vrot.slane %v154_v10, 1  ;;  %v162_v14 = vadd.f32 %v161_v11, %v160_v9  ;;  %v192_v11 = vld [vmem:[#allocation5 + $0x78] sm:$0x1] }
 0x15d   :  { %v156_v15 = vadd.f32 %v155_v13, %v154_v10  ;;  %v163_v16 = vrot.slane %v162_v14, 1 }
 0x15f   :  { %v164_v17 = vadd.f32 %v163_v16, %v162_v14  ;;  %v165_v18 = vmul.f32 0.125, %v156_v15  ;;  %v193_v15 = vld [vmem:[#allocation5 + $0x79] sm:$0x1] }
 0x161   :  { %v166_v19 = vmul.f32 0.125, %v164_v17  ;;  %v167_v20 = vmul.f32 %v165_v18, %v165_v18 }
 0x163   :  { %v168_v24 = vsub.f32 %v166_v19, %v167_v20 }
 0x165   :  { %v169_v25 = vadd.f32 1e-05, %v168_v24 }
 0x167   :  { %475 = vrsqrt.f32 %v169_v25  ;;  %vm176_vm10 = vweird.f32 %v169_v25 }
 0x16d   :  { %v476_v26 = vpop.eup %475 }
 0x16e   :  { %v171_v27 = vmul.f32 %v476_v26, %v169_v25  ;;  %vm177_vm9 = vweird.f32 %v476_v26 }
 0x16f   :  { %vm178_vm11 = vmor %vm176_vm10, %vm177_vm9 }
 0x170   :  { %v172_v28 = vmul.f32 %v476_v26, %v171_v27 }
 0x172   :  { %v173_v29 = vmul.f32 0.5, %v172_v28 }
 0x174   :  { %v174_v30 = vsub.f32 1.5, %v173_v29 }
 0x176   :  { %v175_v32 = vmul.f32 %v476_v26, %v174_v30 }
 0x178   :  { %v179_v33 = vsel %vm178_vm11, %v476_v26, %v175_v32 }
 0x179   :  { %v180_v34 = vmul.f32 %v179_v33, %v128_v31 }
 0x17b   :  { %v181_v36 = vmul.f32 %v180_v34, %v165_v18  ;;  %v183_v37 = vperm.slane %v180_v34, 0 }
 0x17d   :  { %v182_v38 = vsub.f32 %v129_v35, %v181_v36  ;;  %v184_v39 = vmul.f32 %v183_v37, %v145_v1 }
 0x17f   :  { %v185_v40 = vperm.slane %v182_v38, 0 }
 0x181   :  { %v186_v41 = vadd.f32 %v185_v40, %v184_v39 }
 0x183   :  { %vm187_vm12 = vcmp.ge.f32.partialorder %v186_v41, 0.0  ;;  %v188_v42 = vmul.f32 0.01, %v186_v41 }
 0x185   :  { %v189_v43 = vsel %vm187_vm12, %v186_v41, %v188_v42 }
 0x186   :  { %v194_v44 = vpack.c.bf16 %v189_v43, %v189_v43 }
 0x188   :  { %463 = vmatmul.msk.bf16.vlgmr.msra.gmra.mxu2 %vm149_vm8, %v194_v44 }
 0x20b   :  { %v208_v48 = vpop.f32.mrf.mxu2 }
 0x20c   :  { %v220_v49 = vmul.f32 %v208_v48, %v208_v48  ;;  %v213_v50 = vsel %vm212_vm13, %v208_v48, 0.0 }
 0x20d   :  { %v214_v51 = vrot.slane %v213_v50, 4 }
 0x20e   :  { %v221_v52 = vsel %vm212_vm13, %v220_v49, 0.0 }
 0x20f   :  { %v215_v53 = vadd.f32 %v214_v51, %v213_v50  ;;  %v222_v54 = vrot.slane %v221_v52, 4 }
 0x211   :  { %v216_v55 = vrot.slane %v215_v53, 2  ;;  %v223_v56 = vadd.f32 %v222_v54, %v221_v52 }
 0x213   :  { %v210_v57 = vpop.f32.mrf.mxu2  ;;  %v217_v58 = vadd.f32 %v216_v55, %v215_v53  ;;  %v224_v59 = vrot.slane %v223_v56, 2  ;;  %v254_v55 = vld [vmem:[#allocation5 + $0x88] sm:$0x1] }
 0x215   :  { %v218_v60 = vrot.slane %v217_v58, 1  ;;  %v225_v61 = vadd.f32 %v224_v59, %v223_v56  ;;  %v255_v59 = vld [vmem:[#allocation5 + $0x89] sm:$0x1] }
 0x217   :  { %v219_v62 = vadd.f32 %v218_v60, %v217_v58  ;;  %v226_v63 = vrot.slane %v225_v61, 1 }
 0x219   :  { %v227_v0 = vadd.f32 %v226_v63, %v225_v61  ;;  %v228_v1 = vmul.f32 0.125, %v219_v62 }
 0x21b   :  { %v229_v2 = vmul.f32 0.125, %v227_v0  ;;  %v230_v3 = vmul.f32 %v228_v1, %v228_v1 }
 0x21d   :  { %v231_v4 = vsub.f32 %v229_v2, %v230_v3 }
 0x21f   :  { %v232_v5 = vadd.f32 1e-05, %v231_v4 }
 0x221   :  { %477 = vrsqrt.f32 %v232_v5  ;;  %vm239_vm15 = vweird.f32 %v232_v5 }
 0x227   :  { %v478_v6 = vpop.eup %477 }
 0x228   :  { %v234_v7 = vmul.f32 %v478_v6, %v232_v5  ;;  %vm240_vm14 = vweird.f32 %v478_v6 }
 0x229   :  { %vm241_vm0 = vmor %vm239_vm15, %vm240_vm14 }
 0x22a   :  { %v235_v8 = vmul.f32 %v478_v6, %v234_v7 }
 0x22c   :  { %v236_v9 = vmul.f32 0.5, %v235_v8 }
 0x22e   :  { %v237_v10 = vsub.f32 1.5, %v236_v9 }
 0x230   :  { %v238_v12 = vmul.f32 %v478_v6, %v237_v10 }
 0x232   :  { %v242_v13 = vsel %vm241_vm0, %v478_v6, %v238_v12 }
 0x233   :  { %v243_v14 = vmul.f32 %v242_v13, %v192_v11 }
 0x235   :  { %v244_v16 = vmul.f32 %v243_v14, %v228_v1  ;;  %v246_v17 = vperm.slane %v243_v14, 0 }
 0x237   :  { %v245_v18 = vsub.f32 %v193_v15, %v244_v16  ;;  %v247_v19 = vmul.f32 %v246_v17, %v208_v48  ;;  %v328_v48 = vsel %vm326_vm4, %v322_v46, 0 }
 0x238   :  { %337 = vmatpush.bf16.msrb.mxu2 %v328_v48 }
 0x239   :  { %v248_v20 = vperm.slane %v245_v18, 0 }
 0x23b   :  { %v249_v21 = vadd.f32 %v248_v20, %v247_v19 }
 0x23d   :  { %vm250_vm1 = vcmp.ge.f32.partialorder %v249_v21, 0.0  ;;  %v251_v22 = vmul.f32 0.01, %v249_v21 }
 0x23f   :  { %v252_v23 = vsel %vm250_vm1, %v249_v21, %v251_v22 }
 0x240   :  { %v256_v24 = vpack.c.bf16 %v252_v23, %v252_v23 }
 0x242   :  { %464 = vmatmul.msk.bf16.vlgmr.msra.gmra.mxu3 %vm212_vm13, %v256_v24 }
 0x2c5   :  { %v273_v25 = vpop.f32.mrf.mxu3 }
 0x2c6   :  { %v278_v26 = vsel %vm277_vm2, %v273_v25, 0.0  ;;  %v285_v27 = vmul.f32 %v273_v25, %v273_v25 }
 0x2c7   :  { %v279_v28 = vrot.slane %v278_v26, 4 }
 0x2c8   :  { %v286_v29 = vsel %vm277_vm2, %v285_v27, 0.0 }
 0x2c9   :  { %v280_v30 = vadd.f32 %v279_v28, %v278_v26  ;;  %v287_v31 = vrot.slane %v286_v29, 4  ;;  %v384_v26 = vld [vmem:[#allocation5 + $0xa0] sm:$0xff] }
 0x2cb   :  { %v281_v32 = vrot.slane %v280_v30, 2  ;;  %v288_v33 = vadd.f32 %v287_v31, %v286_v29 }
 0x2cd   :  { %v282_v34 = vadd.f32 %v281_v32, %v280_v30  ;;  %v289_v35 = vrot.slane %v288_v33, 2  ;;  %v275_v36 = vpop.f32.mrf.mxu3 }
 0x2cf   :  { %v283_v37 = vrot.slane %v282_v34, 1  ;;  %v290_v38 = vadd.f32 %v289_v35, %v288_v33  ;;  %v319_v35 = vld [vmem:[#allocation5 + $0x96] sm:$0x1] }
 0x2d1   :  { %v284_v39 = vadd.f32 %v283_v37, %v282_v34  ;;  %v291_v40 = vrot.slane %v290_v38, 1 }
 0x2d3   :  { %v292_v41 = vadd.f32 %v291_v40, %v290_v38  ;;  %v293_v42 = vmul.f32 0.125, %v284_v39  ;;  %v320_v39 = vld [vmem:[#allocation5 + $0x97] sm:$0x1] }
 0x2d5   :  { %v294_v43 = vmul.f32 0.125, %v292_v41  ;;  %v295_v44 = vmul.f32 %v293_v42, %v293_v42 }
 0x2d7   :  { %v296_v47 = vsub.f32 %v294_v43, %v295_v44 }
 0x2d9   :  { %v297_v49 = vadd.f32 1e-05, %v296_v47 }
 0x2db   :  { %479 = vrsqrt.f32 %v297_v49  ;;  %vm304_vm6 = vweird.f32 %v297_v49 }
 0x2e1   :  { %v480_v50 = vpop.eup %479 }
 0x2e2   :  { %v299_v51 = vmul.f32 %v480_v50, %v297_v49  ;;  %vm305_vm5 = vweird.f32 %v480_v50 }
 0x2e3   :  { %vm306_vm7 = vmor %vm304_vm6, %vm305_vm5 }
 0x2e4   :  { %v300_v52 = vmul.f32 %v480_v50, %v299_v51 }
 0x2e6   :  { %v301_v53 = vmul.f32 0.5, %v300_v52 }
 0x2e8   :  { %v302_v54 = vsub.f32 1.5, %v301_v53 }
 0x2ea   :  { %v303_v56 = vmul.f32 %v480_v50, %v302_v54 }
 0x2ec   :  { %v307_v57 = vsel %vm306_vm7, %v480_v50, %v303_v56 }
 0x2ed   :  { %v308_v58 = vmul.f32 %v307_v57, %v254_v55 }
 0x2ef   :  { %v309_v60 = vmul.f32 %v308_v58, %v293_v42  ;;  %v311_v61 = vperm.slane %v308_v58, 0 }
 0x2f1   :  { %v310_v62 = vsub.f32 %v255_v59, %v309_v60  ;;  %v312_v63 = vmul.f32 %v311_v61, %v273_v25  ;;  %v383_v25 = vld [vmem:[#allocation5 + $0x98] sm:$0xff] }
 0x2f2   :  { %v388_v28 = vpack.c.bf16 %v384_v26, %v383_v25 }
 0x2f3   :  { %v313_v0 = vperm.slane %v310_v62, 0 }
 0x2f4   :  { %399 = vmatpush.bf16.msrb.mxu3 %v388_v28 }
 0x2f5   :  { %v314_v1 = vadd.f32 %v313_v0, %v312_v63 }
 0x2f7   :  { %v316_v2 = vmul.f32 0.01, %v314_v1  ;;  %vm315_vm9 = vcmp.ge.f32.partialorder %v314_v1, 0.0 }
 0x2f9   :  { %v317_v3 = vsel %vm315_vm9, %v314_v1, %v316_v2 }
 0x2fa   :  { %v321_v4 = vpack.c.bf16 %v317_v3, %v317_v3 }
 0x2fc   :  { %465 = vmatmul.msk.bf16.vlgmr.msrb.gmra.mxu2 %vm277_vm2, %v321_v4 }
 0x37f   :  { %v339_v5 = vpop.f32.mrf.mxu2 }
 0x380   :  { %v343_v6 = vsel %vm149_vm8, %v339_v5, 0.0  ;;  %v350_v7 = vmul.f32 %v339_v5, %v339_v5 }
 0x381   :  { %v344_v8 = vrot.slane %v343_v6, 4 }
 0x382   :  { %v351_v9 = vsel %vm149_vm8, %v350_v7, 0.0 }
 0x383   :  { %v345_v10 = vadd.f32 %v344_v8, %v343_v6  ;;  %v352_v11 = vrot.slane %v351_v9, 4 }
 0x385   :  { %v346_v12 = vrot.slane %v345_v10, 2  ;;  %v353_v13 = vadd.f32 %v352_v11, %v351_v9 }
 0x387   :  { %v347_v14 = vadd.f32 %v346_v12, %v345_v10  ;;  %v354_v15 = vrot.slane %v353_v13, 2  ;;  %v341_v16 = vpop.f32.mrf.mxu2  ;;  %v385_v12 = vld [vmem:[#allocation5 + $0xa8] sm:$0x1] }
 0x388   :  { %v386_v16 = vld [vmem:[#allocation5 + $0xa9] sm:$0x1] }
 0x389   :  { %v348_v17 = vrot.slane %v347_v14, 1  ;;  %v355_v18 = vadd.f32 %v354_v15, %v353_v13 }
 0x38b   :  { %v349_v19 = vadd.f32 %v348_v17, %v347_v14  ;;  %v356_v20 = vrot.slane %v355_v18, 1 }
 0x38d   :  { %v357_v21 = vadd.f32 %v356_v20, %v355_v18  ;;  %v358_v22 = vmul.f32 0.125, %v349_v19 }
 0x38f   :  { %v359_v23 = vmul.f32 0.125, %v357_v21  ;;  %v360_v24 = vmul.f32 %v358_v22, %v358_v22 }
 0x391   :  { %v361_v27 = vsub.f32 %v359_v23, %v360_v24 }
 0x393   :  { %v362_v29 = vadd.f32 1e-05, %v361_v27 }
 0x395   :  { %481 = vrsqrt.f32 %v362_v29  ;;  %vm369_vm11 = vweird.f32 %v362_v29 }
 0x39b   :  { %v482_v30 = vpop.eup %481 }
 0x39c   :  { %v364_v31 = vmul.f32 %v482_v30, %v362_v29  ;;  %vm370_vm10 = vweird.f32 %v482_v30 }
 0x39d   :  { %vm371_vm12 = vmor %vm369_vm11, %vm370_vm10 }
 0x39e   :  { %v365_v32 = vmul.f32 %v482_v30, %v364_v31 }
 0x3a0   :  { %v366_v33 = vmul.f32 0.5, %v365_v32 }
 0x3a2   :  { %v367_v34 = vsub.f32 1.5, %v366_v33 }
 0x3a4   :  { %v368_v36 = vmul.f32 %v482_v30, %v367_v34 }
 0x3a6   :  { %v372_v37 = vsel %vm371_vm12, %v482_v30, %v368_v36 }
 0x3a7   :  { %v373_v38 = vmul.f32 %v372_v37, %v319_v35 }
 0x3a9   :  { %v374_v40 = vmul.f32 %v373_v38, %v358_v22  ;;  %v376_v41 = vperm.slane %v373_v38, 0 }
 0x3ab   :  { %v375_v42 = vsub.f32 %v320_v39, %v374_v40  ;;  %v377_v43 = vmul.f32 %v376_v41, %v339_v5 }
 0x3ad   :  { %v378_v44 = vperm.slane %v375_v42, 0 }
 0x3af   :  { %v379_v45 = vadd.f32 %v378_v44, %v377_v43 }
 0x3b1   :  { %v381_v46 = vmul.f32 0.01, %v379_v45  ;;  %vm380_vm13 = vcmp.ge.f32.partialorder %v379_v45, 0.0 }
 0x3b3   :  { %v382_v47 = vsel %vm380_vm13, %v379_v45, %v381_v46 }
 0x3b4   :  { %v387_v48 = vpack.c.bf16 %v382_v47, %v382_v47 }
 0x3b6   :  { %466 = vmatmul.msk.bf16.vlgmr.msrb.gmra.mxu3 %vm149_vm8, %v387_v48 }
 0x439   :  { %v401_v49 = vpop.f32.mrf.mxu3 }
 0x43a   :  { %v405_v50 = vsel %vm83_vm3, %v401_v49, 0.0  ;;  %v412_v51 = vmul.f32 %v401_v49, %v401_v49 }
 0x43b   :  { %v406_v52 = vrot.slane %v405_v50, 4 }
 0x43c   :  { %v413_v53 = vsel %vm83_vm3, %v412_v51, 0.0 }
 0x43d   :  { %v407_v54 = vadd.f32 %v406_v52, %v405_v50  ;;  %v414_v55 = vrot.slane %v413_v53, 4 }
 0x43f   :  { %v408_v56 = vrot.slane %v407_v54, 2  ;;  %v415_v57 = vadd.f32 %v414_v55, %v413_v53 }
 0x441   :  { %v409_v58 = vadd.f32 %v408_v56, %v407_v54  ;;  %v416_v59 = vrot.slane %v415_v57, 2  ;;  %v403_v60 = vpop.f32.mrf.mxu3 }
 0x443   :  { %v410_v61 = vrot.slane %v409_v58, 1  ;;  %v417_v62 = vadd.f32 %v416_v59, %v415_v57 }
 0x445   :  { %v411_v63 = vadd.f32 %v410_v61, %v409_v58  ;;  %v418_v0 = vrot.slane %v417_v62, 1 }
 0x447   :  { %v419_v1 = vadd.f32 %v418_v0, %v417_v62  ;;  %v420_v2 = vmul.f32 0.125, %v411_v63 }
 0x449   :  { %v421_v3 = vmul.f32 0.125, %v419_v1  ;;  %v422_v4 = vmul.f32 %v420_v2, %v420_v2 }
 0x44b   :  { %v423_v5 = vsub.f32 %v421_v3, %v422_v4 }
 0x44d   :  { %v424_v6 = vadd.f32 1e-05, %v423_v5 }
 0x44f   :  { %483 = vrsqrt.f32 %v424_v6  ;;  %vm431_vm14 = vweird.f32 %v424_v6 }
 0x455   :  { %v484_v7 = vpop.eup %483 }
 0x456   :  { %v426_v8 = vmul.f32 %v484_v7, %v424_v6  ;;  %vm432_vm8 = vweird.f32 %v484_v7 }
 0x457   :  { %vm433_vm15 = vmor %vm431_vm14, %vm432_vm8 }
 0x458   :  { %v427_v9 = vmul.f32 %v484_v7, %v426_v8 }
 0x45a   :  { %v428_v10 = vmul.f32 0.5, %v427_v9 }
 0x45c   :  { %v429_v11 = vsub.f32 1.5, %v428_v10 }
 0x45e   :  { %v430_v13 = vmul.f32 %v484_v7, %v429_v11 }
 0x460   :  { %v434_v14 = vsel %vm433_vm15, %v484_v7, %v430_v13 }
 0x461   :  { %v435_v15 = vmul.f32 %v434_v14, %v385_v12 }
 0x463   :  { %v436_v17 = vmul.f32 %v435_v15, %v420_v2  ;;  %v438_v18 = vperm.slane %v435_v15, 0 }
 0x465   :  { %v437_v19 = vsub.f32 %v386_v16, %v436_v17  ;;  %v439_v20 = vmul.f32 %v438_v18, %v401_v49 }
 0x467   :  { %v440_v21 = vperm.slane %v437_v19, 0 }
 0x469   :  { %v441_v22 = vadd.f32 %v440_v21, %v439_v20 }
 0x46b   :  { %442 = vst.msk [vmem:[#allocation7] sm:$0xff] %vm83_vm3, %v441_v22 }
 0x46c   :  { %453 = dma.vmem_to_hbm [thread:$0]  %s449_s1, 128, %s451_s23, [#allocation4]  }
 0x46d   :  { %561 = dma.done.wait [#allocation4], 128  }
 0x46e   :  { %562 = vsyncadd [#allocation4], 4294967168 }
 0x46f   :  { %458 = vsyncpa [#allocation3], 1 }
 0x470   :  { %459 = vsyncpa [#allocation6], 1 }
 0x471   :  { %460 = vsyncpa [#allocation4], 1 }

</bundles_post_ra>
